<compile_context>
chip_gen: v5e
topology: v5e:2x2
jax: 0.10.0
libtpu: 0.0.40
codegen_flags: <defaults>
</compile_context>

<pallas_src>
import functools

import jax
import jax.numpy as jnp
from jax.experimental import pallas as pl
from jax.experimental.pallas import tpu as pltpu

LANES = 128          # lane width of a vreg
CHUNK = 512          # sublane rows processed per in-kernel compute chunk
                     # (bounds the f32 temporaries independently of the DMA tile)


def _ce_kernel(x_ref, t_ref, out_ref, acc_ref, *, hw, tile_s, chunk_rows,
               n_classes, s_per):
    """One grid step over a (tile_n, C, tile_s, 128) logits block.

    Accumulates log_softmax(x)[target] lane-wise into a single (1, 1, 128)
    vreg; the cross-lane reduce + negation happens only on the last spatial
    step of each (image-block, split) pair.
    """
    p = pl.program_id(1)          # dual-TC spatial split index
    s = pl.program_id(2)          # spatial (reduction) step

    @pl.when(s == 0)
    def _():
        acc_ref[...] = jnp.zeros_like(acc_ref)

    base_row = (p * s_per + s) * tile_s   # first logical sublane row of this block

    def process(r0, rows):
        # r0: start row inside the block (static or traced, multiple of 8);
        # rows: static chunk height.
        t = t_ref[:, 0, pl.ds(r0, rows), :]                       # (tn, rows, 128) i32

        # class-axis max: plain VPU elementwise max across C full-vreg slabs
        m = x_ref[:, 0, pl.ds(r0, rows), :].astype(jnp.float32)
        for ci in range(1, n_classes):
            m = jnp.maximum(m, x_ref[:, ci, pl.ds(r0, rows), :].astype(jnp.float32))

        # second unrolled sweep: sum(exp(x - m)) and the target-gathered logit
        se = jnp.zeros_like(m)
        picked = jnp.zeros_like(m)
        for ci in range(n_classes):
            xc = x_ref[:, ci, pl.ds(r0, rows), :].astype(jnp.float32)
            se = se + jnp.exp(xc - m)
            picked = jnp.where(t == ci, xc, picked)

        lse = jnp.log(se) + m                                     # (tn, rows, 128)

        # mask spatial positions past HW (lane padding, partial edge blocks and
        # the clamped duplicate tiles of an odd dual-TC split)
        row = jax.lax.broadcasted_iota(jnp.int32, m.shape, 1)
        lane = jax.lax.broadcasted_iota(jnp.int32, m.shape, 2)
        pos = (base_row + r0 + row) * LANES + lane
        contrib = jnp.where(pos < hw, picked - lse, 0.0)

        acc_ref[...] = acc_ref[...] + jnp.sum(contrib, axis=(0, 1), keepdims=True)

    n_full = tile_s // chunk_rows
    rem = tile_s - n_full * chunk_rows
    if n_full > 0:
        def body(k, carry):
            process(pl.multiple_of(k * chunk_rows, 8), chunk_rows)
            return carry
        jax.lax.fori_loop(0, n_full, body, 0)
    if rem > 0:
        process(n_full * chunk_rows, rem)                         # static tail slice

    @pl.when(s == pl.num_programs(2) - 1)
    def _():
        out_ref[...] = -jnp.sum(acc_ref[...], keepdims=True)[None]   # (1,1,1,1)


@functools.partial(jax.jit, static_argnames=("tile_rows_hint",))
def criterion_ce_loss(output, target, tile_rows_hint=None):
    """Equivalent of nn.NLLLoss()(F.log_softmax(output, dim=1), target).

    output: (N, C, H, W) float logits;  target: (N, H, W) ints in [0, C).
    Returns the scalar mean cross-entropy (weight=None, reduction='mean').
    `tile_rows_hint` is a test-only cap on the spatial tile (in sublane rows).
    """
    N, C, H, W = output.shape
    HW = H * W
    # TODO(synk): PyTorch ignore_index (-100) and weight= are not handled; the
    # module under translation uses the defaults (all targets in [0, C)).
    # TODO(synk): for very large C (hundreds+) the unrolled class loop should be
    # swapped for the sublane-major layout to avoid code bloat; C is small here.

    # ---- spatial-major view: HW -> (S_rows, 128), free reshape when aligned.
    s_rows = -(-HW // LANES)
    if HW % LANES == 0:
        x = output.reshape(N, C, s_rows, LANES)
        t = target.reshape(N, 1, s_rows, LANES).astype(jnp.int32)
    else:
        # Rare non-128-aligned spatial extent: one padding pass, masked in-kernel.
        pad = s_rows * LANES - HW
        x = jnp.pad(output.reshape(N, C, HW), ((0, 0), (0, 0), (0, pad)))
        x = x.reshape(N, C, s_rows, LANES)
        t = jnp.pad(target.reshape(N, 1, HW), ((0, 0), (0, 0), (0, pad)))
        t = t.reshape(N, 1, s_rows, LANES).astype(jnp.int32)

    # ---- per-generation VMEM sizing with corrected footprint accounting.
    itemsize = jnp.dtype(output.dtype).itemsize
    try:
        vmem_cap = int(pltpu.get_tpu_info().vmem_capacity_bytes)
    except Exception:
        vmem_cap = 64 * 1024 * 1024                      # assume the tight (v7x) case
    if vmem_cap <= 80 * 1024 * 1024:                     # v7x-class: 64 MiB physical
        budget, vmem_limit = 44 * 1024 * 1024, 56 * 1024 * 1024
    else:                                                # v5e / v6e: 128 MiB physical
        budget, vmem_limit = 64 * 1024 * 1024, 96 * 1024 * 1024

    # per sublane row: double-buffered logits + double-buffered int32 targets
    row_pipe = 2 * LANES * (C * itemsize + 4)
    # chunk-sized in-kernel temporaries (m, se, picked, exp, iotas, contrib, ...)
    tmp_fixed = 12 * CHUNK * LANES * 4
    max_rows = max(8, (budget - tmp_fixed) // row_pipe)
    if tile_rows_hint is not None:
        max_rows = max(8, min(max_rows, int(tile_rows_hint)))

    if s_rows <= max_rows:
        tile_s = s_rows                                  # full dim: always legal
    elif max_rows >= CHUNK:
        tile_s = (max_rows // CHUNK) * CHUNK             # no tail chunk in hot path
    else:
        tile_s = (max_rows // 8) * 8
    s_blocks = -(-s_rows // tile_s)

    # ---- tiny problems: fold every image into a single grid step.
    if s_blocks == 1 and N * max(tile_s, 8) <= CHUNK:
        tile_n = N
    else:
        tile_n = 1
    n_blocks = N // tile_n

    # ---- v7x dual-TC: make sure there are >= 2 units of 'parallel' work.
    if n_blocks == 1 and s_blocks >= 2:
        p_split = 2
    else:
        p_split = 1
    s_per = -(-s_blocks // p_split)
    need_clamp = (p_split * s_per != s_blocks)

    def spatial_block(p, s):
        blk = p * s_per + s
        if need_clamp:
            # trailing duplicate tiles of an odd split re-read the last block;
            # their logical positions are >= HW so the kernel masks them to 0.
            blk = jnp.minimum(blk, s_blocks - 1)
        return blk

    partials = pl.pallas_call(
        functools.partial(_ce_kernel, hw=HW, tile_s=tile_s, chunk_rows=CHUNK,
                          n_classes=C, s_per=s_per),
        out_shape=jax.ShapeDtypeStruct((n_blocks, p_split, 1, 1), jnp.float32),
        grid_spec=pltpu.PrefetchScalarGridSpec(
            num_scalar_prefetch=0,
            grid=(n_blocks, p_split, s_per),
            in_specs=[
                pl.BlockSpec((tile_n, C, tile_s, LANES),
                             lambda n, p, s: (n, 0, spatial_block(p, s), 0)),
                pl.BlockSpec((tile_n, 1, tile_s, LANES),
                             lambda n, p, s: (n, 0, spatial_block(p, s), 0)),
            ],
            out_specs=pl.BlockSpec((1, 1, 1, 1), lambda n, p, s: (n, p, 0, 0)),
            scratch_shapes=[pltpu.VMEM((1, 1, LANES), jnp.float32)],
        ),
        compiler_params=pltpu.CompilerParams(
            dimension_semantics=("parallel", "parallel", "arbitrary"),
            vmem_limit_bytes=vmem_limit,
        ),
    )(x, t)

    return jnp.sum(partials) / jnp.float32(N * HW)


if __name__ == "__main__":
    key = jax.random.PRNGKey(0)

    def check(n, c, h, w, **kw):
        k1, k2 = jax.random.split(jax.random.fold_in(key, n * 10000 + c * 1000 + h))
        logits = jax.random.normal(k1, (n, c, h, w), dtype=jnp.float32)
        labels = jax.random.randint(k2, (n, h, w), 0, c, dtype=jnp.int32)
        loss = jax.block_until_ready(criterion_ce_loss(logits, labels, **kw))
        logp = jax.nn.log_softmax(logits, axis=1)
        ref = jnp.mean(-jnp.take_along_axis(logp, labels[:, None], axis=1)[:, 0])
        assert jnp.allclose(loss, ref, rtol=1e-5, atol=1e-5), (loss, ref)

    # module-sized smoke test (whole problem folded into one grid step)
    check(2, 4, 16, 16)
    # HW not a multiple of 128: exercises the padded-lane mask
    check(1, 3, 15, 15)
    # forced small tiles: multi-block streaming + dual-TC spatial split + clamp
    check(1, 5, 32, 80, tile_rows_hint=8)
    # single block larger than one compute chunk: fori chunk loop + static tail
    check(1, 2, 272, 256)
    # chunked blocks + dual-TC split with an odd block count (clamped duplicate)
    check(1, 2, 528, 256, tile_rows_hint=640)

    print("KERNEL_OK")
</pallas_src>

<mosaic_0001>
module attributes {stable_mosaic.version = 11 : i64} {
  func.func @_ce_kernel(%arg0: i32, %arg1: i32, %arg2: i32, %arg3: memref<2x4x2x128xf32, #tpu.memory_space<vmem>>, %arg4: memref<2x1x2x128xi32, #tpu.memory_space<vmem>>, %arg5: memref<1x1x1x1xf32, #tpu.memory_space<vmem>>, %arg6: memref<1x1x128xf32, #tpu.memory_space<vmem>>) attributes {dimension_semantics = [#tpu.dimension_semantics<parallel>, #tpu.dimension_semantics<parallel>, #tpu.dimension_semantics<arbitrary>], iteration_bounds = array<i64: 1, 1, 1>, scalar_prefetch = 0 : i64, scratch_operands = 1 : i64, tpu.core_type = #tpu.core_type<tc>, window_params = [{transform_indices = @transform_0, window_bounds = array<i64: 2, 4, 2, 128>}, {transform_indices = @transform_1, window_bounds = array<i64: 2, 1, 2, 128>}, {transform_indices = @transform_2, window_bounds = array<i64: 1, 1, 1, 1>}]} {
    %c0_i32 = arith.constant 0 : i32
    %0 = arith.cmpi eq, %arg2, %c0_i32 : i32
    %1 = arith.extui %0 : i1 to i32
    %c0_i32_0 = arith.constant 0 : i32
    %2 = arith.cmpi ne, %1, %c0_i32_0 : i32
    scf.if %2 {
      %cst_48 = arith.constant 0.000000e+00 : f32
      %76 = vector.broadcast %cst_48 : f32 to vector<1x1x128xf32>
      %c0_49 = arith.constant 0 : index
      %c0_50 = arith.constant 0 : index
      %c0_51 = arith.constant 0 : index
      %77 = vector.load %arg6[%c0_49, %c0_50, %c0_51] : memref<1x1x128xf32, #tpu.memory_space<vmem>>, vector<1x1x128xf32>
      tpu.vector_store %arg6[%c0_49, %c0_50, %c0_51], %76 {strides = array<i32>} : memref<1x1x128xf32, #tpu.memory_space<vmem>>, vector<1x1x128xf32>,
    } else {
    }
    %c1_i32 = arith.constant 1 : i32
    %3 = arith.muli %arg1, %c1_i32 : i32
    %4 = arith.addi %3, %arg2 : i32
    %c2_i32 = arith.constant 2 : i32
    %5 = arith.muli %4, %c2_i32 : i32
    %c0 = arith.constant 0 : index
    %c0_1 = arith.constant 0 : index
    %c0_2 = arith.constant 0 : index
    %c0_3 = arith.constant 0 : index
    %6 = vector.load %arg4[%c0, %c0_1, %c0_2, %c0_3] : memref<2x1x2x128xi32, #tpu.memory_space<vmem>>, vector<2x1x2x128xi32>
    %7 = vector.shape_cast %6 : vector<2x1x2x128xi32> to vector<2x2x128xi32>
    %c0_4 = arith.constant 0 : index
    %c0_5 = arith.constant 0 : index
    %c0_6 = arith.constant 0 : index
    %c0_7 = arith.constant 0 : index
    %8 = vector.load %arg3[%c0_4, %c0_5, %c0_6, %c0_7] : memref<2x4x2x128xf32, #tpu.memory_space<vmem>>, vector<2x1x2x128xf32>
    %9 = vector.shape_cast %8 : vector<2x1x2x128xf32> to vector<2x2x128xf32>
    %c0_8 = arith.constant 0 : index
    %c1 = arith.constant 1 : index
    %c0_9 = arith.constant 0 : index
    %c0_10 = arith.constant 0 : index
    %10 = vector.load %arg3[%c0_8, %c1, %c0_9, %c0_10] : memref<2x4x2x128xf32, #tpu.memory_space<vmem>>, vector<2x1x2x128xf32>
    %11 = vector.shape_cast %10 : vector<2x1x2x128xf32> to vector<2x2x128xf32>
    %12 = arith.maximumf %9, %11 : vector<2x2x128xf32>
    %c0_11 = arith.constant 0 : index
    %c2 = arith.constant 2 : index
    %c0_12 = arith.constant 0 : index
    %c0_13 = arith.constant 0 : index
    %13 = vector.load %arg3[%c0_11, %c2, %c0_12, %c0_13] : memref<2x4x2x128xf32, #tpu.memory_space<vmem>>, vector<2x1x2x128xf32>
    %14 = vector.shape_cast %13 : vector<2x1x2x128xf32> to vector<2x2x128xf32>
    %15 = arith.maximumf %12, %14 : vector<2x2x128xf32>
    %c0_14 = arith.constant 0 : index
    %c3 = arith.constant 3 : index
    %c0_15 = arith.constant 0 : index
    %c0_16 = arith.constant 0 : index
    %16 = vector.load %arg3[%c0_14, %c3, %c0_15, %c0_16] : memref<2x4x2x128xf32, #tpu.memory_space<vmem>>, vector<2x1x2x128xf32>
    %17 = vector.shape_cast %16 : vector<2x1x2x128xf32> to vector<2x2x128xf32>
    %18 = arith.maximumf %15, %17 : vector<2x2x128xf32>
    %cst = arith.constant 0.000000e+00 : f32
    %19 = vector.broadcast %cst : f32 to vector<2x2x128xf32>
    %cst_17 = arith.constant 0.000000e+00 : f32
    %20 = vector.broadcast %cst_17 : f32 to vector<2x2x128xf32>
    %c0_18 = arith.constant 0 : index
    %c0_19 = arith.constant 0 : index
    %c0_20 = arith.constant 0 : index
    %c0_21 = arith.constant 0 : index
    %21 = vector.load %arg3[%c0_18, %c0_19, %c0_20, %c0_21] : memref<2x4x2x128xf32, #tpu.memory_space<vmem>>, vector<2x1x2x128xf32>
    %22 = vector.shape_cast %21 : vector<2x1x2x128xf32> to vector<2x2x128xf32>
    %23 = arith.subf %22, %18 : vector<2x2x128xf32>
    %24 = math.exp %23 : vector<2x2x128xf32>
    %25 = arith.addf %19, %24 : vector<2x2x128xf32>
    %c0_i32_22 = arith.constant 0 : i32
    %26 = vector.broadcast %c0_i32_22 : i32 to vector<2x2x128xi32>
    %27 = arith.cmpi eq, %7, %26 : vector<2x2x128xi32>
    %28 = arith.select %27, %22, %20 : vector<2x2x128xi1>, vector<2x2x128xf32>
    %c0_23 = arith.constant 0 : index
    %c1_24 = arith.constant 1 : index
    %c0_25 = arith.constant 0 : index
    %c0_26 = arith.constant 0 : index
    %29 = vector.load %arg3[%c0_23, %c1_24, %c0_25, %c0_26] : memref<2x4x2x128xf32, #tpu.memory_space<vmem>>, vector<2x1x2x128xf32>
    %30 = vector.shape_cast %29 : vector<2x1x2x128xf32> to vector<2x2x128xf32>
    %31 = arith.subf %30, %18 : vector<2x2x128xf32>
    %32 = math.exp %31 : vector<2x2x128xf32>
    %33 = arith.addf %25, %32 : vector<2x2x128xf32>
    %c1_i32_27 = arith.constant 1 : i32
    %34 = vector.broadcast %c1_i32_27 : i32 to vector<2x2x128xi32>
    %35 = arith.cmpi eq, %7, %34 : vector<2x2x128xi32>
    %36 = arith.select %35, %30, %28 : vector<2x2x128xi1>, vector<2x2x128xf32>
    %c0_28 = arith.constant 0 : index
    %c2_29 = arith.constant 2 : index
    %c0_30 = arith.constant 0 : index
    %c0_31 = arith.constant 0 : index
    %37 = vector.load %arg3[%c0_28, %c2_29, %c0_30, %c0_31] : memref<2x4x2x128xf32, #tpu.memory_space<vmem>>, vector<2x1x2x128xf32>
    %38 = vector.shape_cast %37 : vector<2x1x2x128xf32> to vector<2x2x128xf32>
    %39 = arith.subf %38, %18 : vector<2x2x128xf32>
    %40 = math.exp %39 : vector<2x2x128xf32>
    %41 = arith.addf %33, %40 : vector<2x2x128xf32>
    %c2_i32_32 = arith.constant 2 : i32
    %42 = vector.broadcast %c2_i32_32 : i32 to vector<2x2x128xi32>
    %43 = arith.cmpi eq, %7, %42 : vector<2x2x128xi32>
    %44 = arith.select %43, %38, %36 : vector<2x2x128xi1>, vector<2x2x128xf32>
    %c0_33 = arith.constant 0 : index
    %c3_34 = arith.constant 3 : index
    %c0_35 = arith.constant 0 : index
    %c0_36 = arith.constant 0 : index
    %45 = vector.load %arg3[%c0_33, %c3_34, %c0_35, %c0_36] : memref<2x4x2x128xf32, #tpu.memory_space<vmem>>, vector<2x1x2x128xf32>
    %46 = vector.shape_cast %45 : vector<2x1x2x128xf32> to vector<2x2x128xf32>
    %47 = arith.subf %46, %18 : vector<2x2x128xf32>
    %48 = math.exp %47 : vector<2x2x128xf32>
    %49 = arith.addf %41, %48 : vector<2x2x128xf32>
    %c3_i32 = arith.constant 3 : i32
    %50 = vector.broadcast %c3_i32 : i32 to vector<2x2x128xi32>
    %51 = arith.cmpi eq, %7, %50 : vector<2x2x128xi32>
    %52 = arith.select %51, %46, %44 : vector<2x2x128xi1>, vector<2x2x128xf32>
    %53 = math.log %49 : vector<2x2x128xf32>
    %54 = arith.addf %53, %18 : vector<2x2x128xf32>
    %55 = tpu.iota {dimensions = array<i32: 1>} : vector<2x2x128xi32>
    %56 = tpu.iota {dimensions = array<i32: 2>} : vector<2x2x128xi32>
    %c0_i32_37 = arith.constant 0 : i32
    %57 = arith.addi %5, %c0_i32_37 : i32
    %58 = vector.broadcast %57 : i32 to vector<2x2x128xi32>
    %59 = arith.addi %58, %55 : vector<2x2x128xi32>
    %c128_i32 = arith.constant 128 : i32
    %60 = vector.broadcast %c128_i32 : i32 to vector<2x2x128xi32>
    %61 = arith.muli %59, %60 : vector<2x2x128xi32>
    %62 = arith.addi %61, %56 : vector<2x2x128xi32>
    %c256_i32 = arith.constant 256 : i32
    %63 = vector.broadcast %c256_i32 : i32 to vector<2x2x128xi32>
    %64 = arith.cmpi slt, %62, %63 : vector<2x2x128xi32>
    %65 = arith.subf %52, %54 : vector<2x2x128xf32>
    %cst_38 = arith.constant 0.000000e+00 : f32
    %66 = vector.broadcast %cst_38 : f32 to vector<2x2x128xf32>
    %67 = arith.select %64, %65, %66 : vector<2x2x128xi1>, vector<2x2x128xf32>
    %c0_39 = arith.constant 0 : index
    %c0_40 = arith.constant 0 : index
    %c0_41 = arith.constant 0 : index
    %68 = vector.load %arg6[%c0_39, %c0_40, %c0_41] : memref<1x1x128xf32, #tpu.memory_space<vmem>>, vector<1x1x128xf32>
    %cst_42 = arith.constant dense<0.000000e+00> : vector<128xf32>
    %69 = vector.multi_reduction <add>, %67, %cst_42 [0, 1] : vector<2x2x128xf32> to vector<128xf32>
    %70 = vector.shape_cast %69 : vector<128xf32> to vector<1x1x128xf32>
    %71 = arith.addf %68, %70 : vector<1x1x128xf32>
    %c0_43 = arith.constant 0 : index
    %c0_44 = arith.constant 0 : index
    %c0_45 = arith.constant 0 : index
    %72 = vector.load %arg6[%c0_43, %c0_44, %c0_45] : memref<1x1x128xf32, #tpu.memory_space<vmem>>, vector<1x1x128xf32>
    tpu.vector_store %arg6[%c0_43, %c0_44, %c0_45], %71 {strides = array<i32>} : memref<1x1x128xf32, #tpu.memory_space<vmem>>, vector<1x1x128xf32>,
    %c0_i32_46 = arith.constant 0 : i32
    %73 = arith.cmpi eq, %arg2, %c0_i32_46 : i32
    %74 = arith.extui %73 : i1 to i32
    %c0_i32_47 = arith.constant 0 : i32
    %75 = arith.cmpi ne, %74, %c0_i32_47 : i32
    scf.if %75 {
      %c0_48 = arith.constant 0 : index
      %c0_49 = arith.constant 0 : index
      %c0_50 = arith.constant 0 : index
      %76 = vector.load %arg6[%c0_48, %c0_49, %c0_50] : memref<1x1x128xf32, #tpu.memory_space<vmem>>, vector<1x1x128xf32>
      %77 = vector.shape_cast %76 : vector<1x1x128xf32> to vector<1x1x1x128xf32>
      %cst_51 = arith.constant dense<0.000000e+00> : vector<1xf32>
      %78 = vector.multi_reduction <add>, %77, %cst_51 [1, 2, 3] : vector<1x1x1x128xf32> to vector<1xf32>
      %79 = vector.shape_cast %78 : vector<1xf32> to vector<1x1x1x1xf32>
      %80 = vector.extract %79[0, 0, 0, 0] : f32 from vector<1x1x1x1xf32>
      %81 = vector.broadcast %80 : f32 to vector<1x1x1xf32>
      %82 = vector.shape_cast %81 : vector<1x1x1xf32> to vector<1x1x1x1xf32>
      %cst_52 = arith.constant 0.000000e+00 : f32
      %83 = vector.broadcast %cst_52 : f32 to vector<1x1x1x1xf32>
      %84 = arith.subf %83, %82 : vector<1x1x1x1xf32>
      %c0_53 = arith.constant 0 : index
      %c0_54 = arith.constant 0 : index
      %c0_55 = arith.constant 0 : index
      %c0_56 = arith.constant 0 : index
      %85 = vector.load %arg5[%c0_53, %c0_54, %c0_55, %c0_56] : memref<1x1x1x1xf32, #tpu.memory_space<vmem>>, vector<1x1x1x1xf32>
      tpu.vector_store %arg5[%c0_53, %c0_54, %c0_55, %c0_56], %84 {strides = array<i32>} : memref<1x1x1x1xf32, #tpu.memory_space<vmem>>, vector<1x1x1x1xf32>,
    } else {
    }
    return
  }
  func.func @transform_0(%arg0: i32, %arg1: i32, %arg2: i32) -> (i32, i32, i32, i32) {
    %c1_i32 = arith.constant 1 : i32
    %0 = arith.muli %arg1, %c1_i32 : i32
    %1 = arith.addi %0, %arg2 : i32
    %c0_i32 = arith.constant 0 : i32
    %c0_i32_0 = arith.constant 0 : i32
    %c0_i32_1 = arith.constant 0 : i32
    return %arg0, %c0_i32, %1, %c0_i32_0 : i32, i32, i32, i32
  }
  func.func @transform_1(%arg0: i32, %arg1: i32, %arg2: i32) -> (i32, i32, i32, i32) {
    %c1_i32 = arith.constant 1 : i32
    %0 = arith.muli %arg1, %c1_i32 : i32
    %1 = arith.addi %0, %arg2 : i32
    %c0_i32 = arith.constant 0 : i32
    %c0_i32_0 = arith.constant 0 : i32
    %c0_i32_1 = arith.constant 0 : i32
    return %arg0, %c0_i32, %1, %c0_i32_0 : i32, i32, i32, i32
  }
  func.func @transform_2(%arg0: i32, %arg1: i32, %arg2: i32) -> (i32, i32, i32, i32) {
    %c0_i32 = arith.constant 0 : i32
    %c0_i32_0 = arith.constant 0 : i32
    %c0_i32_1 = arith.constant 0 : i32
    return %arg0, %arg1, %c0_i32, %c0_i32_0 : i32, i32, i32, i32
  }
}

</mosaic_0001>

<bundles_post_ra>
// kernel: criterion_ce_loss.1
= control target key start
LH: loop header
LB: loop body
LE: loop exit
PB: predicated region body
PF: predicated region fallthrough
CT: control target
= control target key end

     0   :  { %v255_v0 = vmov 0.0   ;;  %s349_s0 = inlined_call_operand.vmem [shape: f32[2,4,2,128], index: 0, kind: input, shape index: {}]   ;;  %s350_s1 = inlined_call_operand.vmem [shape: s32[2,1,2,128], index: 1, kind: input, shape index: {}]   ;;  %s351_s2 = inlined_call_operand.hbm [shape: f32[1,1,1,1], index: 2, kind: output, shape index: {}]  }
   0x1   :  { %50 = vst [vmem:[#allocation2] sm:$0x1] %v255_v0  ;;  %v55_v1 = vld [vmem:[%s349_s0] sm:$0x3]  ;;  %v56_v2 = vld [vmem:[%s349_s0 + $0x8] sm:$0x3] }
   0x2   :  { %v281_v3 = vld [vmem:[%s349_s0 + $0x2] sm:$0x3]  ;;  %v286_v4 = vld [vmem:[%s349_s0 + $0xa] sm:$0x3]  ;;  %v291_v5 = vld [vmem:[%s349_s0 + $0x4] sm:$0x3] }
   0x3   :  { %v60_v6 = vmax.f32 %v55_v1, %v281_v3  ;;  %v61_v7 = vmax.f32 %v56_v2, %v286_v4  ;;  %v298_v8 = vld [vmem:[%s349_s0 + $0xc] sm:$0x3]  ;;  %v303_v9 = vld [vmem:[%s349_s0 + $0x6] sm:$0x3]  ;;  %v308_v10 = vld [vmem:[%s349_s0 + $0xe] sm:$0x3] }
   0x4   :  { %7 = vsyncpa [#allocation4], 0  ;;  %v53_v34 = vld [vmem:[%s350_s1] sm:$0x3]  ;;  %v54_v36 = vld [vmem:[%s350_s1 + $0x2] sm:$0x3]  ;;  %v126_v38 = vlaneseq }
   0x5   :  { %v65_v11 = vmax.f32 %v60_v6, %v291_v5  ;;  %v66_v12 = vmax.f32 %v61_v7, %v298_v8  ;;  %vm80_vm0 = vcmp.eq.s32.totalorder %v53_v34, 0  ;;  %vm81_vm1 = vcmp.eq.s32.totalorder %v54_v36, 0  ;;  %s256_s1 = smov [#allocation3]   ;;  %s178_s3 = sshll.u32 %s351_s2, 4  ;;  %s179_s3 = int_to_ptr.hbm [resolvable:$true] %s178_s3 }
   0x6   :  { %v127_v47 = vshrl.u32 %v126_v38, 7  ;;  %v82_v48 = vsel %vm80_vm0, %v55_v1, 0.0  ;;  %vm92_vm2 = vcmp.eq.s32.totalorder %v53_v34, 1  ;;  %v83_v50 = vsel %vm81_vm1, %v56_v2, 0.0  ;;  %s176_s28 = sshll.u32 %s256_s1, 4  ;;  %s177_s28 = int_to_ptr.vmem [resolvable:$true] %s176_s28 }
   0x7   :  { %v313_v13 = vmax.f32 %v65_v11, %v303_v9  ;;  %v316_v14 = vmax.f32 %v66_v12, %v308_v10  ;;  %vm93_vm3 = vcmp.eq.s32.totalorder %v54_v36, 1  ;;  %v94_v51 = vsel %vm92_vm2, %v281_v3, %v82_v48 }
   0x8   :  { %vm104_vm4 = vcmp.eq.s32.totalorder %v53_v34, 2  ;;  %v129_v52 = vand.u32 127, %v126_v38  ;;  %v132_v53 = vmul.u32 128, %v127_v47  ;;  %v95_v54 = vsel %vm93_vm3, %v286_v4, %v83_v50 }
   0x9   :  { %v72_v15 = vsub.f32 %v55_v1, %v313_v13  ;;  %v73_v16 = vsub.f32 %v56_v2, %v316_v14  ;;  %v84_v17 = vsub.f32 %v281_v3, %v313_v13  ;;  %v85_v18 = vsub.f32 %v286_v4, %v316_v14 }
   0xa   :  { %v96_v19 = vsub.f32 %v291_v5, %v313_v13  ;;  %v97_v20 = vsub.f32 %v298_v8, %v316_v14  ;;  %v108_v24 = vsub.f32 %v303_v9, %v313_v13  ;;  %v109_v26 = vsub.f32 %v308_v10, %v316_v14 }
   0xb   :  { %v74_v21 = vmul.f32 1.442695, %v72_v15  ;;  %v76_v22 = vmul.f32 1.442695, %v73_v16  ;;  %v86_v23 = vmul.f32 1.442695, %v84_v17  ;;  %v106_v55 = vsel %vm104_vm4, %v291_v5, %v94_v51 }
   0xc   :  { %v88_v25 = vmul.f32 1.442695, %v85_v18  ;;  %v98_v27 = vmul.f32 1.442695, %v96_v19  ;;  %v100_v28 = vmul.f32 1.442695, %v97_v20  ;;  %v133_v58 = vadd.s32 %v132_v53, %v129_v52 }
   0xd   :  { %209 = vpow2.f32 %v74_v21  ;;  %v110_v29 = vmul.f32 1.442695, %v108_v24  ;;  %v112_v30 = vmul.f32 1.442695, %v109_v26  ;;  %vm105_vm5 = vcmp.eq.s32.totalorder %v54_v36, 2 }
   0xe   :  { %211 = vpow2.f32 %v76_v22  ;;  %vm116_vm6 = vcmp.eq.s32.totalorder %v53_v34, 3  ;;  %v107_v57 = vsel %vm105_vm5, %v298_v8, %v95_v54  ;;  %vm117_vm7 = vcmp.eq.s32.totalorder %v54_v36, 3  ;;  %v139_v17 = vld [vmem:[#allocation2] sm:$0x1] }
   0xf   :  { %213 = vpow2.f32 %v86_v23  ;;  %v118_v61 = vsel %vm116_vm6, %v303_v9, %v106_v55  ;;  %v119_v63 = vsel %vm117_vm7, %v308_v10, %v107_v57  ;;  %vm134_vm8 = vcmp.lt.s32.totalorder %v133_v58, 256 }
  0x10   :  { %215 = vpow2.f32 %v88_v25  ;;  %vm140_vm9 = vcmask 1041408   ;;  %vm156_vm10 = vcmask 1040384   ;;  %vm169_vm11 = vcmask 0  }
  0x11   :  { %217 = vpow2.f32 %v98_v27 }
  0x12   :  { %219 = vpow2.f32 %v100_v28 }
  0x13   :  { %v210_v31 = vpop.eup %209  ;;  %221 = vpow2.f32 %v110_v29 }
  0x14   :  { %v212_v32 = vpop.eup %211  ;;  %223 = vpow2.f32 %v112_v30 }
  0x15   :  { %v214_v33 = vpop.eup %213 }
  0x16   :  { %v216_v35 = vpop.eup %215  ;;  %v90_v37 = vadd.f32 %v214_v33, %v210_v31 }
  0x17   :  { %v218_v39 = vpop.eup %217  ;;  %v91_v40 = vadd.f32 %v216_v35, %v212_v32 }
  0x18   :  { %v220_v41 = vpop.eup %219  ;;  %v102_v42 = vadd.f32 %v218_v39, %v90_v37 }
  0x19   :  { %v222_v43 = vpop.eup %221  ;;  %v103_v44 = vadd.f32 %v220_v41, %v91_v40 }
  0x1a   :  { %v224_v45 = vpop.eup %223  ;;  %v114_v46 = vadd.f32 %v222_v43, %v102_v42 }
  0x1b   :  { %v115_v49 = vadd.f32 %v224_v45, %v103_v44 }
  0x1c   :  { %225 = vlog2.f32 %v114_v46 }
  0x1d   :  { %227 = vlog2.f32 %v115_v49 }
  0x22   :  { %v226_v56 = vpop.eup %225 }
  0x23   :  { %v228_v59 = vpop.eup %227  ;;  %v121_v60 = vmul.f32 0.6931472, %v226_v56 }
  0x24   :  { %v123_v62 = vmul.f32 0.6931472, %v228_v59 }
  0x25   :  { %v124_v0 = vadd.f32 %v121_v60, %v313_v13 }
  0x26   :  { %v125_v1 = vadd.f32 %v123_v62, %v316_v14 }
  0x27   :  { %v135_v2 = vsub.f32 %v118_v61, %v124_v0 }
  0x28   :  { %v136_v3 = vsub.f32 %v119_v63, %v125_v1 }
  0x29   :  { %v137_v4 = vsel %vm134_vm8, %v135_v2, 0.0 }
  0x2a   :  { %v138_v5 = vsel %vm134_vm8, %v136_v3, 0.0  ;;  %v141_v6 = vsel %vm140_vm9, %v137_v4, 0.0 }
  0x2b   :  { %v142_v7 = vsel %vm140_vm9, %v138_v5, 0.0 }
  0x2c   :  { %v143_v8 = vadd.f32 %v142_v7, %v141_v6 }
  0x2e   :  { %v144_v11 = vrot.slane %v143_v8, 4 }
  0x30   :  { %v145_v12 = vadd.f32 %v144_v11, %v143_v8 }
  0x32   :  { %v146_v15 = vrot.slane %v145_v12, 2 }
  0x34   :  { %v147_v9 = vadd.f32 %v146_v15, %v145_v12 }
  0x36   :  { %v148_v16 = vrot.slane %v147_v9, 1 }
  0x38   :  { %v149_v10 = vadd.f32 %v148_v16, %v147_v9 }
  0x3a   :  { %v150_v18 = vadd.f32 %v149_v10, %v139_v17 }
  0x3c   :  { %151 = vst [vmem:[#allocation2] sm:$0x1] %v150_v18 }
  0x43   :  { %v155_v13 = vld [vmem:[#allocation2] sm:$0x1] }
  0x44   :  { %v157_v14 = vsel %vm156_vm10, %v155_v13, 0.0 }
  0x45   :  { %158 = vadd.xlane.f32.xlu0 %v157_v14 }
  0xb8   :  { %v159_v19 = vpop.xlane.xlu0 %158 }
  0xb9   :  { %v160_v20 = vrot.slane %v159_v19, 4 }
  0xbb   :  { %v161_v21 = vadd.f32 %v160_v20, %v159_v19 }
  0xbd   :  { %v162_v22 = vrot.slane %v161_v21, 2 }
  0xbf   :  { %v163_v23 = vadd.f32 %v162_v22, %v161_v21 }
  0xc1   :  { %v164_v24 = vrot.slane %v163_v23, 1 }
  0xc3   :  { %v165_v25 = vadd.f32 %v164_v24, %v163_v23 }
  0xc5   :  { %205 = vpush %v165_v25 }
  0xf6   :  { %s206_s4 = spop %205 }
  0xf7   :  { %v167_v26 = vstv %s206_s4 }
  0xf8   :  { %v168_v27 = vsub.f32 0.0, %v167_v26 }
  0xfa   :  { %170 = vst.msk [vmem:[#allocation3] sm:$0x1] %vm169_vm11, %v168_v27 }
  0xfb   :  { %181 = dma.vmem_to_hbm [thread:$0]  %s177_s28, 16, %s179_s3, [#allocation4]  }
  0xfc   :  { %253 = dma.done.wait [#allocation4], 16  }
  0xfd   :  { %254 = vsyncadd [#allocation4], 4294967280 }
  0xfe   :  { %186 = vsyncpa [#allocation4], 1 }

</bundles_post_ra>
